<compile_context>
chip_gen: v7x
topology: tpu7x:2x2x1
jax: 0.10.0
libtpu: 0.0.40
codegen_flags: <defaults>
</compile_context>

<pallas_src>
import functools

import jax
import jax.numpy as jnp
from jax.experimental import pallas as pl
from jax.experimental.pallas import tpu as pltpu


def _shift1d_kernel(x_ref, o_ref, *, stride, nb_shifts, W):
    # x_ref : (bn, C,      H*W) block (lane-dense last dim)
    # o_ref : (bn, G*C,    H*W) block, G = 1 + 2*nb_shifts
    bn, C, HW = x_ref.shape

    # Lane-position iota, hoisted out of all loops (built once per grid step).
    lane = jax.lax.broadcasted_iota(jnp.int32, (C, HW), 1)

    for b in range(bn):                      # small static unroll over batch tile
        x = x_ref[b]                         # (C, HW)
        zeros = jnp.zeros_like(x)

        # Group 0: identity copy, stored directly.
        o_ref[b, 0:C, :] = x

        for n in range(nb_shifts):
            m = (n + 1) * stride
            L = m * W                        # flat shift amount (whole rows)

            # "up":   out[i] = x[i + L] for i < HW - L, else 0
            #   roll forward by (HW - L) == roll back by L, then mask the tail.
            up = jnp.where(lane < HW - L, pltpu.roll(x, HW - L, axis=1), zeros)
            # "down": out[i] = x[i - L] for i >= L, else 0
            down = jnp.where(lane >= L, pltpu.roll(x, L, axis=1), zeros)

            o_ref[b, (2 * n + 1) * C:(2 * n + 2) * C, :] = up
            o_ref[b, (2 * n + 2) * C:(2 * n + 3) * C, :] = down


def shift1d_nchw(x, stride=3, nb_shifts=3, *, batch_tile=None):
    """Pallas equivalent of Shift1d_nchw.forward. x: (N, C, H, W)."""
    N, C, H, W = x.shape
    G = 1 + 2 * nb_shifts
    # The PyTorch op silently requires every shift to be smaller than H;
    # make that explicit here.
    assert nb_shifts * stride < H, (
        f"nb_shifts*stride ({nb_shifts * stride}) must be < H ({H})")

    HW = H * W
    xf = x.reshape(N, C, HW)                 # lane-dense view; free reshape

    if batch_tile is None:
        # Size the per-step block against a conservative VMEM budget so the
        # double-buffered (in + out) blocks fit comfortably even on v7x
        # (64 MiB physical / 32 MiB scoped default). Cap the in-kernel unroll.
        per_batch_bytes = (1 + G) * C * HW * x.dtype.itemsize * 2  # dbl-buffered
        budget = 8 * 1024 * 1024
        bn = max(1, min(N, 8, budget // max(per_batch_bytes, 1)))
        while N % bn:
            bn -= 1
    else:
        bn = batch_tile
        assert N % bn == 0

    kernel = functools.partial(
        _shift1d_kernel, stride=stride, nb_shifts=nb_shifts, W=W)

    out = pl.pallas_call(
        kernel,
        out_shape=jax.ShapeDtypeStruct((N, G * C, HW), x.dtype),
        grid_spec=pltpu.PrefetchScalarGridSpec(
            num_scalar_prefetch=0,
            grid=(N // bn,),
            in_specs=[pl.BlockSpec((bn, C, HW), lambda i: (i, 0, 0))],
            out_specs=pl.BlockSpec((bn, G * C, HW), lambda i: (i, 0, 0)),
        ),
        compiler_params=pltpu.CompilerParams(
            dimension_semantics=("parallel",),
            vmem_limit_bytes=32 * 1024 * 1024,
        ),
    )(xf)

    # Groups were written as contiguous channel slices, exactly matching
    # torch.cat(..., dim=1); un-flatten the spatial dims.
    return out.reshape(N, G * C, H, W)


def _reference(x, stride=3, nb_shifts=3):
    """Pure-JAX reference mirroring the PyTorch code (pad2d + slice + cat)."""
    parts = [x]
    for n in range(nb_shifts):
        m = (n + 1) * stride
        up = jnp.pad(x, ((0, 0), (0, 0), (0, m), (0, 0)))[:, :, m:, :]
        down = jnp.pad(x, ((0, 0), (0, 0), (m, 0), (0, 0)))[:, :, :-m, :]
        parts.append(up)
        parts.append(down)
    return jnp.concatenate(parts, axis=1)


if __name__ == "__main__":
    key = jax.random.PRNGKey(0)
    N, C, H, W = 2, 4, 16, 16
    x = jax.random.normal(key, (N, C, H, W), dtype=jnp.float32)

    out = shift1d_nchw(x, stride=3, nb_shifts=3)
    out = jax.block_until_ready(out)

    ref = _reference(x, stride=3, nb_shifts=3)
    assert out.shape == (N, C * (1 + 2 * 3), H, W), out.shape
    assert jnp.allclose(out, ref), "mismatch vs reference"

    print("KERNEL_OK")
</pallas_src>

<mosaic_0001>
module attributes {stable_mosaic.version = 11 : i64} {
  func.func @_shift1d_kernel(%arg0: i32, %arg1: memref<2x4x256xf32, #tpu.memory_space<vmem>>, %arg2: memref<2x28x256xf32, #tpu.memory_space<vmem>>) attributes {dimension_semantics = [#tpu.dimension_semantics<parallel>], iteration_bounds = array<i64: 1>, scalar_prefetch = 0 : i64, scratch_operands = 0 : i64, tpu.core_type = #tpu.core_type<tc>, window_params = [{transform_indices = @transform_0, window_bounds = array<i64: 2, 4, 256>}, {transform_indices = @transform_1, window_bounds = array<i64: 2, 28, 256>}]} {
    %0 = tpu.iota {dimensions = array<i32: 1>} : vector<4x256xi32>
    %c0 = arith.constant 0 : index
    %c0_0 = arith.constant 0 : index
    %c0_1 = arith.constant 0 : index
    %1 = vector.load %arg1[%c0, %c0_0, %c0_1] : memref<2x4x256xf32, #tpu.memory_space<vmem>>, vector<1x4x256xf32>
    %2 = vector.shape_cast %1 : vector<1x4x256xf32> to vector<4x256xf32>
    %cst = arith.constant 0.000000e+00 : f32
    %3 = vector.broadcast %cst : f32 to vector<4x256xf32>
    %c0_2 = arith.constant 0 : index
    %c0_3 = arith.constant 0 : index
    %c0_4 = arith.constant 0 : index
    %4 = vector.load %arg2[%c0_2, %c0_3, %c0_4] : memref<2x28x256xf32, #tpu.memory_space<vmem>>, vector<1x4x256xf32>
    %5 = vector.shape_cast %4 : vector<1x4x256xf32> to vector<4x256xf32>
    %6 = vector.shape_cast %2 : vector<4x256xf32> to vector<1x4x256xf32>
    tpu.vector_store %arg2[%c0_2, %c0_3, %c0_4], %6 {strides = array<i32>} : memref<2x28x256xf32, #tpu.memory_space<vmem>>, vector<1x4x256xf32>,
    %c208_i32 = arith.constant 208 : i32
    %7 = vector.broadcast %c208_i32 : i32 to vector<4x256xi32>
    %8 = arith.cmpi slt, %0, %7 : vector<4x256xi32>
    %c208_i32_5 = arith.constant 208 : i32
    %9 = tpu.dynamic_rotate %2 by %c208_i32_5 dim 1 : vector<4x256xf32>, i32 -> vector<4x256xf32>
    %10 = arith.select %8, %9, %3 : vector<4x256xi1>, vector<4x256xf32>
    %c48_i32 = arith.constant 48 : i32
    %11 = vector.broadcast %c48_i32 : i32 to vector<4x256xi32>
    %12 = arith.cmpi sge, %0, %11 : vector<4x256xi32>
    %c48_i32_6 = arith.constant 48 : i32
    %13 = tpu.dynamic_rotate %2 by %c48_i32_6 dim 1 : vector<4x256xf32>, i32 -> vector<4x256xf32>
    %14 = arith.select %12, %13, %3 : vector<4x256xi1>, vector<4x256xf32>
    %c0_7 = arith.constant 0 : index
    %c4 = arith.constant 4 : index
    %c0_8 = arith.constant 0 : index
    %15 = vector.load %arg2[%c0_7, %c4, %c0_8] : memref<2x28x256xf32, #tpu.memory_space<vmem>>, vector<1x4x256xf32>
    %16 = vector.shape_cast %15 : vector<1x4x256xf32> to vector<4x256xf32>
    %17 = vector.shape_cast %10 : vector<4x256xf32> to vector<1x4x256xf32>
    tpu.vector_store %arg2[%c0_7, %c4, %c0_8], %17 {strides = array<i32>} : memref<2x28x256xf32, #tpu.memory_space<vmem>>, vector<1x4x256xf32>,
    %c0_9 = arith.constant 0 : index
    %c8 = arith.constant 8 : index
    %c0_10 = arith.constant 0 : index
    %18 = vector.load %arg2[%c0_9, %c8, %c0_10] : memref<2x28x256xf32, #tpu.memory_space<vmem>>, vector<1x4x256xf32>
    %19 = vector.shape_cast %18 : vector<1x4x256xf32> to vector<4x256xf32>
    %20 = vector.shape_cast %14 : vector<4x256xf32> to vector<1x4x256xf32>
    tpu.vector_store %arg2[%c0_9, %c8, %c0_10], %20 {strides = array<i32>} : memref<2x28x256xf32, #tpu.memory_space<vmem>>, vector<1x4x256xf32>,
    %c160_i32 = arith.constant 160 : i32
    %21 = vector.broadcast %c160_i32 : i32 to vector<4x256xi32>
    %22 = arith.cmpi slt, %0, %21 : vector<4x256xi32>
    %c160_i32_11 = arith.constant 160 : i32
    %23 = tpu.dynamic_rotate %2 by %c160_i32_11 dim 1 : vector<4x256xf32>, i32 -> vector<4x256xf32>
    %24 = arith.select %22, %23, %3 : vector<4x256xi1>, vector<4x256xf32>
    %c96_i32 = arith.constant 96 : i32
    %25 = vector.broadcast %c96_i32 : i32 to vector<4x256xi32>
    %26 = arith.cmpi sge, %0, %25 : vector<4x256xi32>
    %c96_i32_12 = arith.constant 96 : i32
    %27 = tpu.dynamic_rotate %2 by %c96_i32_12 dim 1 : vector<4x256xf32>, i32 -> vector<4x256xf32>
    %28 = arith.select %26, %27, %3 : vector<4x256xi1>, vector<4x256xf32>
    %c0_13 = arith.constant 0 : index
    %c12 = arith.constant 12 : index
    %c0_14 = arith.constant 0 : index
    %29 = vector.load %arg2[%c0_13, %c12, %c0_14] : memref<2x28x256xf32, #tpu.memory_space<vmem>>, vector<1x4x256xf32>
    %30 = vector.shape_cast %29 : vector<1x4x256xf32> to vector<4x256xf32>
    %31 = vector.shape_cast %24 : vector<4x256xf32> to vector<1x4x256xf32>
    tpu.vector_store %arg2[%c0_13, %c12, %c0_14], %31 {strides = array<i32>} : memref<2x28x256xf32, #tpu.memory_space<vmem>>, vector<1x4x256xf32>,
    %c0_15 = arith.constant 0 : index
    %c16 = arith.constant 16 : index
    %c0_16 = arith.constant 0 : index
    %32 = vector.load %arg2[%c0_15, %c16, %c0_16] : memref<2x28x256xf32, #tpu.memory_space<vmem>>, vector<1x4x256xf32>
    %33 = vector.shape_cast %32 : vector<1x4x256xf32> to vector<4x256xf32>
    %34 = vector.shape_cast %28 : vector<4x256xf32> to vector<1x4x256xf32>
    tpu.vector_store %arg2[%c0_15, %c16, %c0_16], %34 {strides = array<i32>} : memref<2x28x256xf32, #tpu.memory_space<vmem>>, vector<1x4x256xf32>,
    %c112_i32 = arith.constant 112 : i32
    %35 = vector.broadcast %c112_i32 : i32 to vector<4x256xi32>
    %36 = arith.cmpi slt, %0, %35 : vector<4x256xi32>
    %c112_i32_17 = arith.constant 112 : i32
    %37 = tpu.dynamic_rotate %2 by %c112_i32_17 dim 1 : vector<4x256xf32>, i32 -> vector<4x256xf32>
    %38 = arith.select %36, %37, %3 : vector<4x256xi1>, vector<4x256xf32>
    %c144_i32 = arith.constant 144 : i32
    %39 = vector.broadcast %c144_i32 : i32 to vector<4x256xi32>
    %40 = arith.cmpi sge, %0, %39 : vector<4x256xi32>
    %c144_i32_18 = arith.constant 144 : i32
    %41 = tpu.dynamic_rotate %2 by %c144_i32_18 dim 1 : vector<4x256xf32>, i32 -> vector<4x256xf32>
    %42 = arith.select %40, %41, %3 : vector<4x256xi1>, vector<4x256xf32>
    %c0_19 = arith.constant 0 : index
    %c20 = arith.constant 20 : index
    %c0_20 = arith.constant 0 : index
    %43 = vector.load %arg2[%c0_19, %c20, %c0_20] : memref<2x28x256xf32, #tpu.memory_space<vmem>>, vector<1x4x256xf32>
    %44 = vector.shape_cast %43 : vector<1x4x256xf32> to vector<4x256xf32>
    %45 = vector.shape_cast %38 : vector<4x256xf32> to vector<1x4x256xf32>
    tpu.vector_store %arg2[%c0_19, %c20, %c0_20], %45 {strides = array<i32>} : memref<2x28x256xf32, #tpu.memory_space<vmem>>, vector<1x4x256xf32>,
    %c0_21 = arith.constant 0 : index
    %c24 = arith.constant 24 : index
    %c0_22 = arith.constant 0 : index
    %46 = vector.load %arg2[%c0_21, %c24, %c0_22] : memref<2x28x256xf32, #tpu.memory_space<vmem>>, vector<1x4x256xf32>
    %47 = vector.shape_cast %46 : vector<1x4x256xf32> to vector<4x256xf32>
    %48 = vector.shape_cast %42 : vector<4x256xf32> to vector<1x4x256xf32>
    tpu.vector_store %arg2[%c0_21, %c24, %c0_22], %48 {strides = array<i32>} : memref<2x28x256xf32, #tpu.memory_space<vmem>>, vector<1x4x256xf32>,
    %c1 = arith.constant 1 : index
    %c0_23 = arith.constant 0 : index
    %c0_24 = arith.constant 0 : index
    %49 = vector.load %arg1[%c1, %c0_23, %c0_24] : memref<2x4x256xf32, #tpu.memory_space<vmem>>, vector<1x4x256xf32>
    %50 = vector.shape_cast %49 : vector<1x4x256xf32> to vector<4x256xf32>
    %cst_25 = arith.constant 0.000000e+00 : f32
    %51 = vector.broadcast %cst_25 : f32 to vector<4x256xf32>
    %c1_26 = arith.constant 1 : index
    %c0_27 = arith.constant 0 : index
    %c0_28 = arith.constant 0 : index
    %52 = vector.load %arg2[%c1_26, %c0_27, %c0_28] : memref<2x28x256xf32, #tpu.memory_space<vmem>>, vector<1x4x256xf32>
    %53 = vector.shape_cast %52 : vector<1x4x256xf32> to vector<4x256xf32>
    %54 = vector.shape_cast %50 : vector<4x256xf32> to vector<1x4x256xf32>
    tpu.vector_store %arg2[%c1_26, %c0_27, %c0_28], %54 {strides = array<i32>} : memref<2x28x256xf32, #tpu.memory_space<vmem>>, vector<1x4x256xf32>,
    %c208_i32_29 = arith.constant 208 : i32
    %55 = vector.broadcast %c208_i32_29 : i32 to vector<4x256xi32>
    %56 = arith.cmpi slt, %0, %55 : vector<4x256xi32>
    %c208_i32_30 = arith.constant 208 : i32
    %57 = tpu.dynamic_rotate %50 by %c208_i32_30 dim 1 : vector<4x256xf32>, i32 -> vector<4x256xf32>
    %58 = arith.select %56, %57, %51 : vector<4x256xi1>, vector<4x256xf32>
    %c48_i32_31 = arith.constant 48 : i32
    %59 = vector.broadcast %c48_i32_31 : i32 to vector<4x256xi32>
    %60 = arith.cmpi sge, %0, %59 : vector<4x256xi32>
    %c48_i32_32 = arith.constant 48 : i32
    %61 = tpu.dynamic_rotate %50 by %c48_i32_32 dim 1 : vector<4x256xf32>, i32 -> vector<4x256xf32>
    %62 = arith.select %60, %61, %51 : vector<4x256xi1>, vector<4x256xf32>
    %c1_33 = arith.constant 1 : index
    %c4_34 = arith.constant 4 : index
    %c0_35 = arith.constant 0 : index
    %63 = vector.load %arg2[%c1_33, %c4_34, %c0_35] : memref<2x28x256xf32, #tpu.memory_space<vmem>>, vector<1x4x256xf32>
    %64 = vector.shape_cast %63 : vector<1x4x256xf32> to vector<4x256xf32>
    %65 = vector.shape_cast %58 : vector<4x256xf32> to vector<1x4x256xf32>
    tpu.vector_store %arg2[%c1_33, %c4_34, %c0_35], %65 {strides = array<i32>} : memref<2x28x256xf32, #tpu.memory_space<vmem>>, vector<1x4x256xf32>,
    %c1_36 = arith.constant 1 : index
    %c8_37 = arith.constant 8 : index
    %c0_38 = arith.constant 0 : index
    %66 = vector.load %arg2[%c1_36, %c8_37, %c0_38] : memref<2x28x256xf32, #tpu.memory_space<vmem>>, vector<1x4x256xf32>
    %67 = vector.shape_cast %66 : vector<1x4x256xf32> to vector<4x256xf32>
    %68 = vector.shape_cast %62 : vector<4x256xf32> to vector<1x4x256xf32>
    tpu.vector_store %arg2[%c1_36, %c8_37, %c0_38], %68 {strides = array<i32>} : memref<2x28x256xf32, #tpu.memory_space<vmem>>, vector<1x4x256xf32>,
    %c160_i32_39 = arith.constant 160 : i32
    %69 = vector.broadcast %c160_i32_39 : i32 to vector<4x256xi32>
    %70 = arith.cmpi slt, %0, %69 : vector<4x256xi32>
    %c160_i32_40 = arith.constant 160 : i32
    %71 = tpu.dynamic_rotate %50 by %c160_i32_40 dim 1 : vector<4x256xf32>, i32 -> vector<4x256xf32>
    %72 = arith.select %70, %71, %51 : vector<4x256xi1>, vector<4x256xf32>
    %c96_i32_41 = arith.constant 96 : i32
    %73 = vector.broadcast %c96_i32_41 : i32 to vector<4x256xi32>
    %74 = arith.cmpi sge, %0, %73 : vector<4x256xi32>
    %c96_i32_42 = arith.constant 96 : i32
    %75 = tpu.dynamic_rotate %50 by %c96_i32_42 dim 1 : vector<4x256xf32>, i32 -> vector<4x256xf32>
    %76 = arith.select %74, %75, %51 : vector<4x256xi1>, vector<4x256xf32>
    %c1_43 = arith.constant 1 : index
    %c12_44 = arith.constant 12 : index
    %c0_45 = arith.constant 0 : index
    %77 = vector.load %arg2[%c1_43, %c12_44, %c0_45] : memref<2x28x256xf32, #tpu.memory_space<vmem>>, vector<1x4x256xf32>
    %78 = vector.shape_cast %77 : vector<1x4x256xf32> to vector<4x256xf32>
    %79 = vector.shape_cast %72 : vector<4x256xf32> to vector<1x4x256xf32>
    tpu.vector_store %arg2[%c1_43, %c12_44, %c0_45], %79 {strides = array<i32>} : memref<2x28x256xf32, #tpu.memory_space<vmem>>, vector<1x4x256xf32>,
    %c1_46 = arith.constant 1 : index
    %c16_47 = arith.constant 16 : index
    %c0_48 = arith.constant 0 : index
    %80 = vector.load %arg2[%c1_46, %c16_47, %c0_48] : memref<2x28x256xf32, #tpu.memory_space<vmem>>, vector<1x4x256xf32>
    %81 = vector.shape_cast %80 : vector<1x4x256xf32> to vector<4x256xf32>
    %82 = vector.shape_cast %76 : vector<4x256xf32> to vector<1x4x256xf32>
    tpu.vector_store %arg2[%c1_46, %c16_47, %c0_48], %82 {strides = array<i32>} : memref<2x28x256xf32, #tpu.memory_space<vmem>>, vector<1x4x256xf32>,
    %c112_i32_49 = arith.constant 112 : i32
    %83 = vector.broadcast %c112_i32_49 : i32 to vector<4x256xi32>
    %84 = arith.cmpi slt, %0, %83 : vector<4x256xi32>
    %c112_i32_50 = arith.constant 112 : i32
    %85 = tpu.dynamic_rotate %50 by %c112_i32_50 dim 1 : vector<4x256xf32>, i32 -> vector<4x256xf32>
    %86 = arith.select %84, %85, %51 : vector<4x256xi1>, vector<4x256xf32>
    %c144_i32_51 = arith.constant 144 : i32
    %87 = vector.broadcast %c144_i32_51 : i32 to vector<4x256xi32>
    %88 = arith.cmpi sge, %0, %87 : vector<4x256xi32>
    %c144_i32_52 = arith.constant 144 : i32
    %89 = tpu.dynamic_rotate %50 by %c144_i32_52 dim 1 : vector<4x256xf32>, i32 -> vector<4x256xf32>
    %90 = arith.select %88, %89, %51 : vector<4x256xi1>, vector<4x256xf32>
    %c1_53 = arith.constant 1 : index
    %c20_54 = arith.constant 20 : index
    %c0_55 = arith.constant 0 : index
    %91 = vector.load %arg2[%c1_53, %c20_54, %c0_55] : memref<2x28x256xf32, #tpu.memory_space<vmem>>, vector<1x4x256xf32>
    %92 = vector.shape_cast %91 : vector<1x4x256xf32> to vector<4x256xf32>
    %93 = vector.shape_cast %86 : vector<4x256xf32> to vector<1x4x256xf32>
    tpu.vector_store %arg2[%c1_53, %c20_54, %c0_55], %93 {strides = array<i32>} : memref<2x28x256xf32, #tpu.memory_space<vmem>>, vector<1x4x256xf32>,
    %c1_56 = arith.constant 1 : index
    %c24_57 = arith.constant 24 : index
    %c0_58 = arith.constant 0 : index
    %94 = vector.load %arg2[%c1_56, %c24_57, %c0_58] : memref<2x28x256xf32, #tpu.memory_space<vmem>>, vector<1x4x256xf32>
    %95 = vector.shape_cast %94 : vector<1x4x256xf32> to vector<4x256xf32>
    %96 = vector.shape_cast %90 : vector<4x256xf32> to vector<1x4x256xf32>
    tpu.vector_store %arg2[%c1_56, %c24_57, %c0_58], %96 {strides = array<i32>} : memref<2x28x256xf32, #tpu.memory_space<vmem>>, vector<1x4x256xf32>,
    return
  }
  func.func @transform_0(%arg0: i32) -> (i32, i32, i32) {
    %c0_i32 = arith.constant 0 : i32
    %c0_i32_0 = arith.constant 0 : i32
    %c0_i32_1 = arith.constant 0 : i32
    return %arg0, %c0_i32, %c0_i32_0 : i32, i32, i32
  }
  func.func @transform_1(%arg0: i32) -> (i32, i32, i32) {
    %c0_i32 = arith.constant 0 : i32
    %c0_i32_0 = arith.constant 0 : i32
    %c0_i32_1 = arith.constant 0 : i32
    return %arg0, %c0_i32, %c0_i32_0 : i32, i32, i32
  }
}

</mosaic_0001>

<bundles_post_ra>
// kernel: tpu_custom_call.1
= control target key start
LH: loop header
LB: loop body
LE: loop exit
PB: predicated region body
PF: predicated region fallthrough
CT: control target
= control target key end

     0   :  { %6 = vsyncpa [#allocation3], 0  ;;  %s267_s6 = smov [#allocation2]   ;;  %s463_s0 = inlined_call_operand.hbm [shape: f32[2,4,256], index: 0, kind: input, shape index: {}]   ;;  %s464_s1 = inlined_call_operand.vmem [shape: f32[2,28,256], index: 1, kind: output, shape index: {}]  }
   0x1   :  { %s12_s7 = sshll.u32 %s267_s6, 4  ;;  %s243_s10 = scalar_lea.hbm %s463_s0, 256  ;;  %s13_s7 = int_to_ptr.vmem [resolvable:$true] %s12_s7 }
   0x2   :  { %p244_p0 = scmp.ne.s32.totalorder %s463_s0, %s243_s10  ;;  %p247_p1 = scmp.lt.u32.totalorder %s243_s10, %s463_s0 }
   0x4   :  { %p249_p2 = pnand %p247_p1, %p244_p0 }
   0x6   :  { %252 = shalt.err (!%p249_p2)
}
   0x7   :  { %s253_s15 = scalar_lea.vmem %s13_s7, 256  ;;  %p258_p4 = scmp.lt.s32.totalorder %s13_s7, %s13_s7 }
   0x8   :  { %p254_p3 = scmp.ne.s32.totalorder %s13_s7, %s253_s15  ;;  %p259_p5 = scmp.lt.s32.totalorder %s253_s15, %s253_s15 }
   0xa   :  { %p260_p6 = por %p259_p5, %p258_p4 }
   0xc   :  { %p261_p7 = pnand %p260_p6, %p254_p3 }
   0xe   :  { %264 = shalt.err (!%p261_p7)
}
   0xf   :  { %s268_s16 = smov 128   ;;  %s269_s17 = smov 8  }
  0x10   :  { %18 = dma.hbm_to_vmem [thread:$0]  %s463_s0, 256, %s13_s7, [#allocation3], %s268_s16, %s268_s16, %s269_s17  }
  0x11   :  { %265 = dma.done.wait [#allocation3], 256  }
  0x12   :  { %266 = vsyncadd [#allocation3], 4294967040  ;;  %v270_v0 = vmov 0.0   ;;  %v25_v2 = vld [vmem:[#allocation2] sm:$0xff]  ;;  %v127_v3 = vld [vmem:[#allocation2 + $0x8] sm:$0xff]  ;;  %s271_s0 = smov 32   ;;  %v22_v6 = vlaneseq }
  0x13   :  { %v119_v1 = vrot.slane %v270_v0, 4  ;;  %124 = vst [vmem:[%s464_s1 + $0x30] sm:$0xf] %v270_v0  ;;  %229 = vst [vmem:[%s464_s1 + $0x70] sm:$0xf] %v270_v0  ;;  %65 = vrot.lane.b32.xlu1 %v25_v2, %s271_s0  ;;  %s272_s30 = smov 80   ;;  %v27_v4 = vcombine.high %v25_v2, %v25_v2  ;;  %v129_v5 = vcombine.high %v127_v3, %v127_v3 }
  0x14   :  { %29 = vst [vmem:[%s464_s1] sm:$0xf] %v25_v2  ;;  %33 = vrot.lane.b32.xlu0 %v25_v2, %s272_s30  ;;  %217 = vst [vmem:[%s464_s1 + $0x40] sm:$0xf] %v127_v3  ;;  %s273_s8 = smov 112   ;;  %s274_s9 = smov 48   ;;  %v323_v7 = vand.u32 127, %v22_v6 }
  0x15   :  { %123 = vst [vmem:[%s464_s1 + $0x28] sm:$0xf0] %v119_v1  ;;  %228 = vst [vmem:[%s464_s1 + $0x68] sm:$0xf0] %v119_v1  ;;  %s275_s10 = smov 96   ;;  %s276_s11 = smov 16  }
  0x16   :  { %30 = vst [vmem:[%s464_s1 + $0x8] sm:$0xf] %v27_v4  ;;  %218 = vst [vmem:[%s464_s1 + $0x48] sm:$0xf] %v129_v5  ;;  %v326_v8 = vadd.s32 128, %v323_v7  ;;  %vm69_vm0 = vcmp.lt.s32.totalorder %v323_v7, 32 }
  0x17   :  { %67 = vrot.lane.b32.xlu1 %v27_v4, %s271_s0  ;;  %vm95_vm2 = vcmp.lt.s32.totalorder %v323_v7, 112  ;;  %vm37_vm3 = vcmp.lt.s32.totalorder %v323_v7, 80  ;;  %vm48_vm5 = vcmp.lt.s32.totalorder %v323_v7, 48  ;;  %vm42_vm6 = vcmp.ge.s32.totalorder %v323_v7, 48 }
  0x18   :  { %97 = vrot.lane.b32.xlu0 %v25_v2, %s273_s8  ;;  %vm64_vm1 = vcmp.lt.s32.totalorder %v326_v8, 160  ;;  %vm32_vm4 = vcmp.lt.s32.totalorder %v326_v8, 208  ;;  %vm80_vm7 = vcmp.lt.s32.totalorder %v323_v7, 96  ;;  %vm74_vm8 = vcmp.ge.s32.totalorder %v323_v7, 96 }
  0x19   :  { %vm111_vm9 = vcmp.lt.s32.totalorder %v323_v7, 16  ;;  %vm106_vm10 = vcmp.ge.s32.totalorder %v326_v8, 144 }
  0x1b   :  { %99 = vrot.lane.b32.xlu1 %v27_v4, %s273_s8 }
  0x1c   :  { %35 = vrot.lane.b32.xlu0 %v27_v4, %s272_s30 }
  0x1f   :  { %136 = vrot.lane.b32.xlu1 %v129_v5, %s272_s30 }
  0x20   :  { %134 = vrot.lane.b32.xlu0 %v127_v3, %s272_s30 }
  0x23   :  { %162 = vrot.lane.b32.xlu1 %v129_v5, %s271_s0 }
  0x24   :  { %160 = vrot.lane.b32.xlu0 %v127_v3, %s271_s0 }
  0x27   :  { %188 = vrot.lane.b32.xlu1 %v129_v5, %s273_s8 }
  0x28   :  { %186 = vrot.lane.b32.xlu0 %v127_v3, %s273_s8 }
  0x2b   :  { %46 = vrot.lane.b32.xlu1 %v27_v4, %s274_s9 }
  0x2c   :  { %44 = vrot.lane.b32.xlu0 %v25_v2, %s274_s9 }
  0x2f   :  { %78 = vrot.lane.b32.xlu1 %v27_v4, %s275_s10 }
  0x30   :  { %76 = vrot.lane.b32.xlu0 %v25_v2, %s275_s10 }
  0x33   :  { %109 = vrot.lane.b32.xlu1 %v27_v4, %s276_s11 }
  0x34   :  { %107 = vrot.lane.b32.xlu0 %v25_v2, %s276_s11 }
  0x37   :  { %144 = vrot.lane.b32.xlu1 %v129_v5, %s274_s9 }
  0x38   :  { %142 = vrot.lane.b32.xlu0 %v127_v3, %s274_s9 }
  0x3b   :  { %170 = vrot.lane.b32.xlu1 %v129_v5, %s275_s10 }
  0x3c   :  { %168 = vrot.lane.b32.xlu0 %v127_v3, %s275_s10 }
  0x3f   :  { %196 = vrot.lane.b32.xlu1 %v129_v5, %s276_s11 }
  0x40   :  { %194 = vrot.lane.b32.xlu0 %v127_v3, %s276_s11 }
  0x85   :  { %v66_v9 = vpop.permute.xlu1 %65 }
  0x86   :  { %v34_v10 = vpop.permute.xlu0 %33 }
  0x89   :  { %v68_v12 = vpop.permute.xlu1 %67 }
  0x8a   :  { %v98_v11 = vpop.permute.xlu0 %97  ;;  %v70_v13 = vsel %vm69_vm0, %v66_v9, %v68_v12  ;;  %v71_v14 = vsel %vm69_vm0, %v68_v12, %v66_v9 }
  0x8b   :  { %v73_v15 = vsel %vm64_vm1, %v71_v14, 0.0  ;;  %v87_v16 = vrot.slane %v70_v13, 4 }
  0x8c   :  { %v88_v17 = vrot.slane %v73_v15, 4 }
  0x8d   :  { %91 = vst [vmem:[%s464_s1 + $0x10] sm:$0xf0] %v87_v16  ;;  %v100_v18 = vpop.permute.xlu1 %99 }
  0x8e   :  { %v36_v19 = vpop.permute.xlu0 %35  ;;  %92 = vst [vmem:[%s464_s1 + $0x18] sm:$0xf0] %v88_v17  ;;  %v102_v20 = vsel %vm95_vm2, %v100_v18, %v98_v11 }
  0x8f   :  { %v38_v21 = vsel %vm37_vm3, %v34_v10, %v36_v19  ;;  %v39_v22 = vsel %vm37_vm3, %v36_v19, %v34_v10  ;;  %v103_v23 = vsel %vm95_vm2, %v102_v20, 0.0 }
  0x90   :  { %v41_v24 = vsel %vm32_vm4, %v39_v22, 0.0  ;;  %v55_v25 = vrot.slane %v38_v21, 4  ;;  %v118_v26 = vrot.slane %v103_v23, 4 }
  0x91   :  { %v56_v27 = vrot.slane %v41_v24, 4  ;;  %v137_v28 = vpop.permute.xlu1 %136 }
  0x92   :  { %59 = vst [vmem:[%s464_s1] sm:$0xf0] %v55_v25  ;;  %v135_v29 = vpop.permute.xlu0 %134  ;;  %122 = vst [vmem:[%s464_s1 + $0x20] sm:$0xf0] %v118_v26 }
  0x93   :  { %60 = vst [vmem:[%s464_s1 + $0x8] sm:$0xf0] %v56_v27  ;;  %v138_v30 = vsel %vm37_vm3, %v135_v29, %v137_v28  ;;  %v139_v31 = vsel %vm37_vm3, %v137_v28, %v135_v29 }
  0x94   :  { %v141_v32 = vsel %vm32_vm4, %v139_v31, 0.0  ;;  %v152_v33 = vrot.slane %v138_v30, 4 }
  0x95   :  { %v153_v34 = vrot.slane %v141_v32, 4  ;;  %v163_v35 = vpop.permute.xlu1 %162 }
  0x96   :  { %219 = vst [vmem:[%s464_s1 + $0x40] sm:$0xf0] %v152_v33  ;;  %v161_v36 = vpop.permute.xlu0 %160 }
  0x97   :  { %220 = vst [vmem:[%s464_s1 + $0x48] sm:$0xf0] %v153_v34  ;;  %v164_v37 = vsel %vm69_vm0, %v161_v36, %v163_v35  ;;  %v165_v38 = vsel %vm69_vm0, %v163_v35, %v161_v36 }
  0x98   :  { %v167_v39 = vsel %vm64_vm1, %v165_v38, 0.0  ;;  %v178_v40 = vrot.slane %v164_v37, 4 }
  0x99   :  { %v179_v41 = vrot.slane %v167_v39, 4  ;;  %v189_v42 = vpop.permute.xlu1 %188 }
  0x9a   :  { %223 = vst [vmem:[%s464_s1 + $0x50] sm:$0xf0] %v178_v40  ;;  %v187_v43 = vpop.permute.xlu0 %186 }
  0x9b   :  { %224 = vst [vmem:[%s464_s1 + $0x58] sm:$0xf0] %v179_v41  ;;  %v191_v44 = vsel %vm95_vm2, %v189_v42, %v187_v43 }
  0x9c   :  { %v192_v45 = vsel %vm95_vm2, %v191_v44, 0.0 }
  0x9d   :  { %v204_v46 = vrot.slane %v192_v45, 4  ;;  %v47_v47 = vpop.permute.xlu1 %46 }
  0x9e   :  { %v45_v48 = vpop.permute.xlu0 %44 }
  0x9f   :  { %227 = vst [vmem:[%s464_s1 + $0x60] sm:$0xf0] %v204_v46  ;;  %v49_v49 = vsel %vm48_vm5, %v45_v48, %v47_v47  ;;  %v50_v50 = vsel %vm48_vm5, %v47_v47, %v45_v48 }
  0xa0   :  { %v51_v51 = vsel %vm42_vm6, %v50_v50, 0.0  ;;  %62 = vst [vmem:[%s464_s1 + $0x18] sm:$0xf] %v49_v49 }
  0xa1   :  { %61 = vst [vmem:[%s464_s1 + $0x10] sm:$0xf] %v51_v51  ;;  %v79_v52 = vpop.permute.xlu1 %78 }
  0xa2   :  { %v77_v53 = vpop.permute.xlu0 %76 }
  0xa3   :  { %v81_v54 = vsel %vm80_vm7, %v77_v53, %v79_v52  ;;  %v82_v55 = vsel %vm80_vm7, %v79_v52, %v77_v53 }
  0xa4   :  { %v83_v56 = vsel %vm74_vm8, %v82_v55, 0.0  ;;  %94 = vst [vmem:[%s464_s1 + $0x28] sm:$0xf] %v81_v54 }
  0xa5   :  { %93 = vst [vmem:[%s464_s1 + $0x20] sm:$0xf] %v83_v56  ;;  %v110_v57 = vpop.permute.xlu1 %109 }
  0xa6   :  { %v108_v58 = vpop.permute.xlu0 %107 }
  0xa7   :  { %v113_v59 = vsel %vm111_vm9, %v110_v57, %v108_v58 }
  0xa8   :  { %v115_v60 = vsel %vm106_vm10, %v113_v59, 0.0 }
  0xa9   :  { %125 = vst [vmem:[%s464_s1 + $0x38] sm:$0xf] %v115_v60  ;;  %v145_v61 = vpop.permute.xlu1 %144 }
  0xaa   :  { %v143_v62 = vpop.permute.xlu0 %142 }
  0xab   :  { %v146_v63 = vsel %vm48_vm5, %v143_v62, %v145_v61  ;;  %v147_v0 = vsel %vm48_vm5, %v145_v61, %v143_v62 }
  0xac   :  { %v148_v1 = vsel %vm42_vm6, %v147_v0, 0.0  ;;  %222 = vst [vmem:[%s464_s1 + $0x58] sm:$0xf] %v146_v63 }
  0xad   :  { %221 = vst [vmem:[%s464_s1 + $0x50] sm:$0xf] %v148_v1  ;;  %v171_v2 = vpop.permute.xlu1 %170 }
  0xae   :  { %v169_v3 = vpop.permute.xlu0 %168 }
  0xaf   :  { %v172_v4 = vsel %vm80_vm7, %v169_v3, %v171_v2  ;;  %v173_v5 = vsel %vm80_vm7, %v171_v2, %v169_v3 }
  0xb0   :  { %v174_v6 = vsel %vm74_vm8, %v173_v5, 0.0  ;;  %226 = vst [vmem:[%s464_s1 + $0x68] sm:$0xf] %v172_v4 }
  0xb1   :  { %225 = vst [vmem:[%s464_s1 + $0x60] sm:$0xf] %v174_v6  ;;  %v197_v9 = vpop.permute.xlu1 %196 }
  0xb2   :  { %v195_v10 = vpop.permute.xlu0 %194 }
  0xb3   :  { %v199_v11 = vsel %vm111_vm9, %v197_v9, %v195_v10 }
  0xb4   :  { %v201_v12 = vsel %vm106_vm10, %v199_v11, 0.0 }
  0xb5   :  { %230 = vst [vmem:[%s464_s1 + $0x78] sm:$0xf] %v201_v12 }
  0xb6   :  { %216 = vsyncpa [#allocation3], 1 }

</bundles_post_ra>
